<compile_context>
chip_gen: v7x
topology: tpu7x:2x2x1
jax: 0.10.0
libtpu: 0.0.40
codegen_flags: <defaults>
</compile_context>

<pallas_src>
import functools

import jax
import jax.numpy as jnp
from jax.experimental import pallas as pl
from jax.experimental.pallas import tpu as pltpu


def _conv_rows_kernel(x0_ref, x1_ref, x2_ref, w_ref, b_ref, o_ref):
    # x{0,1,2}_ref : (1, TH, (W+2)*Cin)  row-shifted (dy = 0,1,2) padded-input slabs
    # w_ref        : (3, (W+2)*Cin, N)   banded conv weight, N = C*r*W*r (lane-dense)
    # b_ref        : (1, N)              bias row, already in PixelShuffle column order
    # o_ref        : (1, TH, N)          conv + bias + ReLU output rows
    th, n = o_ref.shape[1], o_ref.shape[2]
    acc = jnp.broadcast_to(b_ref[...], (th, n)).astype(jnp.float32)  # bias init (one broadcast)
    for dy, x_ref in enumerate((x0_ref, x1_ref, x2_ref)):
        # NOTE: casting matmul inputs to bf16 (f32 accumulation) would ~3x MXU throughput
        # on v6e/v7x; kept f32 here to match the f32 reference at 1e-4 tolerance.
        acc = acc + jnp.dot(x_ref[0], w_ref[dy], preferred_element_type=jnp.float32)
    o_ref[...] = jnp.maximum(acc, 0.0)[None]


def _row_tile(h):
    # Multiple of 8 sublanes; keep >=2 row tiles per image when possible so the pipeline
    # has steps to overlap (and both v7x TensorCores get work even for small B).
    if h % 8 == 0 and h >= 16 and (h // 2) % 8 == 0:
        return h // 2
    return h


def _build_banded_weight(weight_hwio, w_spatial, scale):
    # weight_hwio: (3, 3, Cin, Cout), Cout = scale^2 * C (C == Cin).
    # Returns band: (3, (W+2)*Cin, C*r*W*r) with
    #   band[dy, (w+dx)*Cin + ci, ((c*r + ry)*W + w)*r + rx] = weight[dy, dx, ci, c*r*r + ry*r + rx]
    # i.e. the dx shift lives in the row structure and the output columns are already in
    # PixelShuffle order (c, ry, w, rx).
    kh, kw, cin, cout = weight_hwio.shape
    r = scale
    c = cout // (r * r)
    w6 = weight_hwio.reshape(kh, kw, cin, c, r, r).astype(jnp.float32)
    planes = []
    for dy in range(kh):
        m = jnp.zeros((w_spatial + 2, cin, c, r, w_spatial, r), jnp.float32)
        for dx in range(kw):
            # ones at (w + dx, w): selects input column w+dx for output column w
            shift = jnp.pad(jnp.eye(w_spatial, dtype=jnp.float32),
                            ((dx, kw - 1 - dx), (0, 0)))
            m = m + shift[:, None, None, None, :, None] * w6[dy, dx][None, :, :, :, None, :]
        planes.append(m.reshape((w_spatial + 2) * cin, c * r * w_spatial * r))
    return jnp.stack(planes, axis=0)


@functools.partial(jax.jit, static_argnames=("scale",))
def upsampler_forward(x_nchw, weight_hwio, bias, scale=2):
    """Conv2d(C -> scale^2*C, k=3, pad=1, bias) -> PixelShuffle(scale) -> ReLU.

    x_nchw      : (B, C, H, W) float32 (PyTorch NCHW)
    weight_hwio : (3, 3, C, scale^2*C)   (HWIO layout of the torch conv weight)
    bias        : (scale^2*C,)
    returns     : (B, C, H*scale, W*scale) float32
    """
    b, c, h, w = x_nchw.shape
    r = scale
    cout = r * r * c
    assert weight_hwio.shape == (3, 3, c, cout) and bias.shape == (cout,)

    # ---- wrapper-side layout plumbing: lane-dense row slabs for the kernel ----
    x_nhwc = jnp.transpose(x_nchw, (0, 2, 3, 1))
    x_rows = jnp.pad(x_nhwc, ((0, 0), (1, 1), (1, 1), (0, 0))).reshape(b, h + 2, (w + 2) * c)
    x0 = x_rows[:, 0:h, :]        # dy = 0 slab
    x1 = x_rows[:, 1:h + 1, :]    # dy = 1 slab
    x2 = x_rows[:, 2:h + 2, :]    # dy = 2 slab

    w_band = _build_banded_weight(weight_hwio, w, scale)            # (3, (W+2)*C, N)
    n_cols = c * r * w * r
    bias_row = jnp.broadcast_to(bias.reshape(c, r, r)[:, :, None, :],
                                (c, r, w, r)).reshape(1, n_cols)    # (c, ry, w, rx) order

    th = _row_tile(h)
    win = (w + 2) * c
    grid = (b, h // th)

    y = pl.pallas_call(
        _conv_rows_kernel,
        out_shape=jax.ShapeDtypeStruct((b, h, n_cols), jnp.float32),
        grid=grid,
        in_specs=[
            pl.BlockSpec((1, th, win), lambda bi, ti: (bi, ti, 0)),
            pl.BlockSpec((1, th, win), lambda bi, ti: (bi, ti, 0)),
            pl.BlockSpec((1, th, win), lambda bi, ti: (bi, ti, 0)),
            pl.BlockSpec((3, win, n_cols), lambda bi, ti: (0, 0, 0)),   # resident weight
            pl.BlockSpec((1, n_cols), lambda bi, ti: (0, 0)),           # resident bias row
        ],
        out_specs=pl.BlockSpec((1, th, n_cols), lambda bi, ti: (bi, ti, 0)),
        compiler_params=pltpu.CompilerParams(
            dimension_semantics=("parallel", "parallel"),
            vmem_limit_bytes=32 * 1024 * 1024,  # raise v5e default; within v6e/v7x limits
        ),
    )(x0, x1, x2, w_band, bias_row)

    # PixelShuffle epilogue: columns already ordered (c, ry, w, rx) -> single
    # reshape/transpose inside the same jit.
    # TODO(synk): fully fuse this transpose into the kernel's out_spec (write blocks of
    # shape (1, C, r, W*r)) to remove the remaining full-tensor HBM pass.
    y = y.reshape(b, h, c, r, w, r)
    y = jnp.transpose(y, (0, 2, 1, 3, 4, 5))
    return y.reshape(b, c, h * r, w * r)


def _reference(x_nchw, weight_hwio, bias, scale=2):
    # Pure-JAX reference: conv (cross-correlation) -> bias -> PixelShuffle -> ReLU, NCHW.
    b, c, h, w = x_nchw.shape
    r = scale
    w_oihw = jnp.transpose(weight_hwio, (3, 2, 0, 1))
    y = jax.lax.conv_general_dilated(
        x_nchw, w_oihw, window_strides=(1, 1), padding=((1, 1), (1, 1)),
        dimension_numbers=("NCHW", "OIHW", "NCHW"))
    y = y + bias[None, :, None, None]
    y = y.reshape(b, c, r, r, h, w)
    y = jnp.transpose(y, (0, 1, 4, 2, 5, 3))
    y = y.reshape(b, c, h * r, w * r)
    return jnp.maximum(y, 0.0)


if __name__ == "__main__":
    B, nFeat, H, W = 2, 4, 16, 16
    scale = 2
    Cout = scale * scale * nFeat

    key = jax.random.PRNGKey(0)
    kx, kw, kb = jax.random.split(key, 3)
    x = jax.random.normal(kx, (B, nFeat, H, W), dtype=jnp.float32)
    weight = 0.1 * jax.random.normal(kw, (3, 3, nFeat, Cout), dtype=jnp.float32)
    bias = 0.1 * jax.random.normal(kb, (Cout,), dtype=jnp.float32)

    out = jax.block_until_ready(upsampler_forward(x, weight, bias, scale=scale))
    ref = jax.block_until_ready(_reference(x, weight, bias, scale=scale))

    assert out.shape == (B, nFeat, H * scale, W * scale)
    assert jnp.allclose(out, ref, atol=1e-4, rtol=1e-4), float(jnp.max(jnp.abs(out - ref)))

    print("KERNEL_OK")
</pallas_src>

<mosaic_0001>
module attributes {stable_mosaic.version = 11 : i64} {
  func.func @_conv_rows_kernel(%arg0: i32, %arg1: i32, %arg2: memref<1x8x72xf32, #tpu.memory_space<vmem>>, %arg3: memref<1x8x72xf32, #tpu.memory_space<vmem>>, %arg4: memref<1x8x72xf32, #tpu.memory_space<vmem>>, %arg5: memref<3x72x256xf32, #tpu.memory_space<vmem>>, %arg6: memref<1x256xf32, #tpu.memory_space<vmem>>, %arg7: memref<1x8x256xf32, #tpu.memory_space<vmem>>) attributes {dimension_semantics = [#tpu.dimension_semantics<parallel>, #tpu.dimension_semantics<parallel>], iteration_bounds = array<i64: 2, 2>, scalar_prefetch = 0 : i64, scratch_operands = 0 : i64, tpu.core_type = #tpu.core_type<tc>, window_params = [{transform_indices = @transform_0, window_bounds = array<i64: 1, 8, 72>}, {transform_indices = @transform_1, window_bounds = array<i64: 1, 8, 72>}, {transform_indices = @transform_2, window_bounds = array<i64: 1, 8, 72>}, {pipeline_mode = #tpu.pipeline_mode<synchronous>, transform_indices = @transform_3, window_bounds = array<i64: 3, 72, 256>}, {pipeline_mode = #tpu.pipeline_mode<synchronous>, transform_indices = @transform_4, window_bounds = array<i64: 1, 256>}, {transform_indices = @transform_5, window_bounds = array<i64: 1, 8, 256>}]} {
    %c0 = arith.constant 0 : index
    %c0_0 = arith.constant 0 : index
    %0 = vector.load %arg6[%c0, %c0_0] : memref<1x256xf32, #tpu.memory_space<vmem>>, vector<1x256xf32>
    %1 = vector.shape_cast %0 : vector<1x256xf32> to vector<1x256xf32>
    %2 = vector.broadcast %1 : vector<1x256xf32> to vector<8x256xf32>
    %c0_1 = arith.constant 0 : index
    %c0_2 = arith.constant 0 : index
    %c0_3 = arith.constant 0 : index
    %3 = vector.load %arg2[%c0_1, %c0_2, %c0_3] : memref<1x8x72xf32, #tpu.memory_space<vmem>>, vector<1x8x72xf32>
    %4 = vector.shape_cast %3 : vector<1x8x72xf32> to vector<8x72xf32>
    %c0_4 = arith.constant 0 : index
    %c0_5 = arith.constant 0 : index
    %c0_6 = arith.constant 0 : index
    %5 = vector.load %arg5[%c0_4, %c0_5, %c0_6] : memref<3x72x256xf32, #tpu.memory_space<vmem>>, vector<1x72x256xf32>
    %6 = vector.shape_cast %5 : vector<1x72x256xf32> to vector<72x256xf32>
    %cst = arith.constant dense<0.000000e+00> : vector<8x256xf32>
    %7 = tpu.matmul %4, %6, %cst {dimension_numbers = #tpu.dot_dimension_numbers<[1], [0], [0], [1], [0, 0, 1, 1], [], []>} : vector<8x72xf32>, vector<72x256xf32>, vector<8x256xf32> -> vector<8x256xf32>
    %8 = arith.addf %2, %7 : vector<8x256xf32>
    %c0_7 = arith.constant 0 : index
    %c0_8 = arith.constant 0 : index
    %c0_9 = arith.constant 0 : index
    %9 = vector.load %arg3[%c0_7, %c0_8, %c0_9] : memref<1x8x72xf32, #tpu.memory_space<vmem>>, vector<1x8x72xf32>
    %10 = vector.shape_cast %9 : vector<1x8x72xf32> to vector<8x72xf32>
    %c1 = arith.constant 1 : index
    %c0_10 = arith.constant 0 : index
    %c0_11 = arith.constant 0 : index
    %11 = vector.load %arg5[%c1, %c0_10, %c0_11] : memref<3x72x256xf32, #tpu.memory_space<vmem>>, vector<1x72x256xf32>
    %12 = vector.shape_cast %11 : vector<1x72x256xf32> to vector<72x256xf32>
    %cst_12 = arith.constant dense<0.000000e+00> : vector<8x256xf32>
    %13 = tpu.matmul %10, %12, %cst_12 {dimension_numbers = #tpu.dot_dimension_numbers<[1], [0], [0], [1], [0, 0, 1, 1], [], []>} : vector<8x72xf32>, vector<72x256xf32>, vector<8x256xf32> -> vector<8x256xf32>
    %14 = arith.addf %8, %13 : vector<8x256xf32>
    %c0_13 = arith.constant 0 : index
    %c0_14 = arith.constant 0 : index
    %c0_15 = arith.constant 0 : index
    %15 = vector.load %arg4[%c0_13, %c0_14, %c0_15] : memref<1x8x72xf32, #tpu.memory_space<vmem>>, vector<1x8x72xf32>
    %16 = vector.shape_cast %15 : vector<1x8x72xf32> to vector<8x72xf32>
    %c2 = arith.constant 2 : index
    %c0_16 = arith.constant 0 : index
    %c0_17 = arith.constant 0 : index
    %17 = vector.load %arg5[%c2, %c0_16, %c0_17] : memref<3x72x256xf32, #tpu.memory_space<vmem>>, vector<1x72x256xf32>
    %18 = vector.shape_cast %17 : vector<1x72x256xf32> to vector<72x256xf32>
    %cst_18 = arith.constant dense<0.000000e+00> : vector<8x256xf32>
    %19 = tpu.matmul %16, %18, %cst_18 {dimension_numbers = #tpu.dot_dimension_numbers<[1], [0], [0], [1], [0, 0, 1, 1], [], []>} : vector<8x72xf32>, vector<72x256xf32>, vector<8x256xf32> -> vector<8x256xf32>
    %20 = arith.addf %14, %19 : vector<8x256xf32>
    %cst_19 = arith.constant 0.000000e+00 : f32
    %21 = vector.broadcast %cst_19 : f32 to vector<8x256xf32>
    %22 = arith.maximumf %20, %21 : vector<8x256xf32>
    %23 = vector.shape_cast %22 : vector<8x256xf32> to vector<1x8x256xf32>
    %c0_20 = arith.constant 0 : index
    %c0_21 = arith.constant 0 : index
    %c0_22 = arith.constant 0 : index
    %24 = vector.load %arg7[%c0_20, %c0_21, %c0_22] : memref<1x8x256xf32, #tpu.memory_space<vmem>>, vector<1x8x256xf32>
    tpu.vector_store %arg7[%c0_20, %c0_21, %c0_22], %23 {strides = array<i32>} : memref<1x8x256xf32, #tpu.memory_space<vmem>>, vector<1x8x256xf32>,
    return
  }
  func.func @transform_0(%arg0: i32, %arg1: i32) -> (i32, i32, i32) {
    %c0_i32 = arith.constant 0 : i32
    %c0_i32_0 = arith.constant 0 : i32
    return %arg0, %arg1, %c0_i32 : i32, i32, i32
  }
  func.func @transform_1(%arg0: i32, %arg1: i32) -> (i32, i32, i32) {
    %c0_i32 = arith.constant 0 : i32
    %c0_i32_0 = arith.constant 0 : i32
    return %arg0, %arg1, %c0_i32 : i32, i32, i32
  }
  func.func @transform_2(%arg0: i32, %arg1: i32) -> (i32, i32, i32) {
    %c0_i32 = arith.constant 0 : i32
    %c0_i32_0 = arith.constant 0 : i32
    return %arg0, %arg1, %c0_i32 : i32, i32, i32
  }
  func.func @transform_3(%arg0: i32, %arg1: i32) -> (i32, i32, i32) {
    %c0_i32 = arith.constant 0 : i32
    %c0_i32_0 = arith.constant 0 : i32
    %c0_i32_1 = arith.constant 0 : i32
    %c0_i32_2 = arith.constant 0 : i32
    return %c0_i32, %c0_i32_0, %c0_i32_1 : i32, i32, i32
  }
  func.func @transform_4(%arg0: i32, %arg1: i32) -> (i32, i32) {
    %c0_i32 = arith.constant 0 : i32
    %c0_i32_0 = arith.constant 0 : i32
    %c0_i32_1 = arith.constant 0 : i32
    return %c0_i32, %c0_i32_0 : i32, i32
  }
  func.func @transform_5(%arg0: i32, %arg1: i32) -> (i32, i32, i32) {
    %c0_i32 = arith.constant 0 : i32
    %c0_i32_0 = arith.constant 0 : i32
    return %arg0, %arg1, %c0_i32 : i32, i32, i32
  }
}

</mosaic_0001>

<bundles_post_ra>
// kernel: upsampler_forward.1
= control target key start
LH: loop header
LB: loop body
LE: loop exit
PB: predicated region body
PF: predicated region fallthrough
CT: control target
= control target key end

     0   :  { %s973_s18 = smov 0   ;;  %s975_s19 = smov 0   ;;  %s1226_s0 = inlined_call_operand.vmem [shape: f32[2,16,72], index: 0, kind: input, shape index: {}]   ;;  %s1227_s1 = inlined_call_operand.vmem [shape: f32[2,16,72], index: 1, kind: input, shape index: {}]   ;;  %s1228_s2 = inlined_call_operand.vmem [shape: f32[2,16,72], index: 2, kind: input, shape index: {}]   ;;  %s1229_s3 = inlined_call_operand.vmem [shape: f32[3,72,256], index: 3, kind: input, shape index: {}]   ;;  %s1230_s4 = inlined_call_operand.vmem [shape: f32[1,256], index: 4, kind: input, shape index: {}]   ;;  %s1231_s5 = inlined_call_operand.vmem [shape: f32[2,16,256], index: 5, kind: output, shape index: {}]  }
   0x1   :  { %s977_s20 = smov 0   ;;  %s979_s21 = smov 0  }
   0x2   :  { %s981_s22 = smov 0  }
   0x3 LB: > { %s24_s23 = sadd.s32 1, %s932_s20  ;;  %s27_s24 = sadd.s32 1, %s936_s21  ;;  %s940_s22 = sphi %s981_s22, %s15_s22   ;;  %s936_s21 = sphi %s979_s21, %s1235_s21   ;;  %s932_s20 = sphi %s977_s20, %s1234_s20   ;;  %s928_s19 = sphi %s975_s19, %s1233_s19   ;;  %s924_s18 = sphi %s973_s18, %s1232_s18  }
   0x4   : > { %p25_p0 = scmp.ge.s32.totalorder %s24_s23, 2  ;;  %p756_p1 = scmp.ge.s32.totalorder %s940_s22, 1 }
   0x5   : > { %p236_p2 = scmp.lt.s32.totalorder %s940_s22, 5 }
   0x6   : > { %s1237_s23 = smov (%p25_p0, %s24_s23), 0  ;;  %s1239_s24 = smov (!%p25_p0, %s27_s24), %s936_s21 }
   0x7   : > { %p237_p3 = pnand %p756_p1, %p236_p2  ;;  %p29_p4 = scmp.ge.s32.totalorder %s1239_s24, 2 }
   0x8   : > { %v768_v0 = vld [vmem:[%s1229_s3 + $0x98] sm:$0xff] (!%p237_p3)  ;;  %v770_v1 = vld [vmem:[%s1229_s3 + $0xa8] sm:$0xff] (!%p237_p3)  ;;  %v767_v2 = vld [vmem:[%s1229_s3 + $0x90] sm:$0xff] (!%p237_p3)  ;;  %p287_p5 = scmp.lt.s32.totalorder (!%p237_p3), %s928_s19, 1  ;;  %v942_v7 = vmov (!%p237_p3), 0.0   ;;  %p289_p6 = scmp.lt.s32.totalorder (!%p237_p3), %s924_s18, 1 }
   0x9   : > { %s1241_s24 = smov (%p29_p4, %s1239_s24), 0  ;;  %240 = sbr.rel (%p237_p3) target bundleno = 266 (0x10a), region = 40 }
   0xa   : > { %v823_v3 = vpack.c.bf16 (!%p237_p3), %v770_v1, %v768_v0  ;;  %v769_v4 = vld [vmem:[%s1229_s3 + $0xa0] sm:$0xff] (!%p237_p3)  ;;  %v772_v5 = vld [vmem:[%s1229_s3 + $0xb8] sm:$0xff] (!%p237_p3)  ;;  %v774_v6 = vld [vmem:[%s1229_s3 + $0xc8] sm:$0xff] (!%p237_p3)  ;;  %515 = vmatprep.mubr.f32.mxu0 (!%p237_p3), %v942_v7  ;;  %419 = vmatprep.mubr.f32.mxu1 (!%p237_p3), %v942_v7  ;;  %vm351_vm0 = vcmask (!%p237_p3), 588800  }
   0xb   : > { %v825_v8 = vpack.c.bf16 (!%p237_p3), %v769_v4, %v767_v2  ;;  %v827_v9 = vpack.c.bf16 (!%p237_p3), %v774_v6, %v772_v5  ;;  %v771_v10 = vld [vmem:[%s1229_s3 + $0xb0] sm:$0xff] (!%p237_p3)  ;;  %v773_v11 = vld [vmem:[%s1229_s3 + $0xc0] sm:$0xff] (!%p237_p3)  ;;  %v776_v12 = vld [vmem:[%s1229_s3 + $0xd8] sm:$0xff] (!%p237_p3) }
   0xc   : > { %824 = vmatprep.subr.bf16.mxu0 (!%p237_p3), %v823_v3  ;;  %v778_v13 = vld [vmem:[%s1229_s3 + $0xe8] sm:$0xff] (!%p237_p3)  ;;  %v829_v14 = vpack.c.bf16 (!%p237_p3), %v773_v11, %v771_v10  ;;  %v775_v15 = vld [vmem:[%s1229_s3 + $0xd0] sm:$0xff] (!%p237_p3)  ;;  %v777_v16 = vld [vmem:[%s1229_s3 + $0xe0] sm:$0xff] (!%p237_p3) }
   0xd   : > { %826 = vmatpush1.bf16.msra.mxu0 (!%p237_p3), %v825_v8  ;;  %v831_v17 = vpack.c.bf16 (!%p237_p3), %v778_v13, %v776_v12  ;;  %v780_v18 = vld [vmem:[%s1229_s3 + $0xf8] sm:$0xff] (!%p237_p3)  ;;  %v334_v19 = vld [vmem:[%s1229_s3 + $0x8] sm:$0xff] (!%p237_p3)  ;;  %v333_v23 = vld [vmem:[%s1229_s3] sm:$0xff] (!%p237_p3)  ;;  %v833_v26 = vpack.c.bf16 (!%p237_p3), %v777_v16, %v775_v15 }
   0xe   : > { %828 = vmatprep.subr.bf16.mxu0 (!%p237_p3), %v827_v9  ;;  %v336_v20 = vld [vmem:[%s1229_s3 + $0x18] sm:$0xff] (!%p237_p3)  ;;  %v782_v21 = vld [vmem:[%s1229_s3 + $0x108] sm:$0xff] (!%p237_p3)  ;;  %v335_v24 = vld [vmem:[%s1229_s3 + $0x10] sm:$0xff] (!%p237_p3) }
   0xf   : > { %v807_v22 = vpack.c.bf16 (!%p237_p3), %v336_v20, %v334_v19  ;;  %v809_v25 = vpack.c.bf16 (!%p237_p3), %v335_v24, %v333_v23  ;;  %v338_v27 = vld [vmem:[%s1229_s3 + $0x28] sm:$0xff] (!%p237_p3)  ;;  %v340_v28 = vld [vmem:[%s1229_s3 + $0x38] sm:$0xff] (!%p237_p3)  ;;  %v835_v29 = vpack.c.bf16 (!%p237_p3), %v782_v21, %v780_v18  ;;  %v779_v30 = vld [vmem:[%s1229_s3 + $0xf0] sm:$0xff] (!%p237_p3)  ;;  %v322_v18 = vlaneseq (!%p237_p3) }
  0x10   : > { %s1243_s19 = smov (!%p287_p5, %s928_s19), 1  ;;  %s1245_s18 = smov (!%p289_p6, %s924_s18), 1  ;;  %v781_v31 = vld [vmem:[%s1229_s3 + $0x100] sm:$0xff]  ;;  %v811_v32 = vpack.c.bf16 %v340_v28, %v338_v27  ;;  %v339_v34 = vld [vmem:[%s1229_s3 + $0x30] sm:$0xff]  ;;  %v342_v36 = vld [vmem:[%s1229_s3 + $0x48] sm:$0xff] }
  0x11   : > { %s757_s25 = sshll.u32 %s1243_s19, 1  ;;  %830 = vmatpush1.bf16.msra.mxu0 %v829_v14  ;;  %808 = vmatprep.subr.bf16.mxu1 %v807_v22  ;;  %v337_v33 = vld [vmem:[%s1229_s3 + $0x20] sm:$0xff]  ;;  %v344_v37 = vld [vmem:[%s1229_s3 + $0x58] sm:$0xff]  ;;  %v837_v38 = vpack.c.bf16 %v781_v31, %v779_v30  ;;  %v343_v41 = vld [vmem:[%s1229_s3 + $0x50] sm:$0xff]  ;;  %v323_v19 = vshrl.u32 %v322_v18, 7  ;;  %s764_s17 = sshll.u32 %s1243_s19, 2 }
  0x12   : > { %832 = vmatprep.subr.bf16.mxu0 %v831_v17  ;;  %810 = vmatpush1.bf16.msra.mxu1 %v809_v25  ;;  %s292_s9 = sadd.s32 %s757_s25, %s1245_s18  ;;  %v813_v35 = vpack.c.bf16 %v339_v34, %v337_v33  ;;  %v815_v39 = vpack.c.bf16 %v344_v37, %v342_v36  ;;  %v341_v40 = vld [vmem:[%s1229_s3 + $0x40] sm:$0xff]  ;;  %v784_v42 = vld [vmem:[%s1229_s3 + $0x118] sm:$0xff]  ;;  %v787_v43 = vld [vmem:[%s1229_s3 + $0x128] sm:$0xff] }
  0x13   : > { %812 = vmatprep.subr.bf16.mxu1 %v811_v32  ;;  %s1101_s25 = sshll.u32 %s292_s9, 3  ;;  %v817_v44 = vpack.c.bf16 %v343_v41, %v341_v40  ;;  %v346_v45 = vld [vmem:[%s1229_s3 + $0x68] sm:$0xff]  ;;  %v789_v46 = vld [vmem:[%s1229_s3 + $0x138] sm:$0xff]  ;;  %v786_v47 = vld [vmem:[%s1229_s3 + $0x120] sm:$0xff]  ;;  %v324_v21 = vsub.s32 0, %v323_v19  ;;  %v328_v24 = vsub.s32 1, %v323_v19 }
  0x14   : > { %v348_v48 = vld [vmem:[%s1229_s3 + $0x78] sm:$0xff]  ;;  %s302_s27 = scalar_lea.vmem %s1227_s1, %s1101_s25  ;;  %v788_v49 = vld [vmem:[%s1229_s3 + $0x130] sm:$0xff]  ;;  %v345_v51 = vld [vmem:[%s1229_s3 + $0x60] sm:$0xff]  ;;  %v839_v56 = vpack.c.bf16 %v789_v46, %v787_v43  ;;  %s294_s10 = scalar_lea.vmem %s1226_s0, %s1101_s25 }
  0x15   : > { %834 = vmatpush1.bf16.msra.mxu0 %v833_v26  ;;  %v819_v50 = vpack.c.bf16 %v348_v48, %v346_v45  ;;  %v347_v52 = vld [vmem:[%s1229_s3 + $0x70] sm:$0xff]  ;;  %v791_v53 = vld [vmem:[%s1229_s3 + $0x148] sm:$0xff]  ;;  %v793_v54 = vld [vmem:[%s1229_s3 + $0x158] sm:$0xff]  ;;  %v841_v58 = vpack.c.bf16 %v788_v49, %v786_v47  ;;  %s310_s12 = scalar_lea.vmem %s1228_s2, %s1101_s25  ;;  %s763_s25 = sshll.u32 %s1245_s18, 1 }
  0x16   : > { %836 = vmatprep.subr.bf16.mxu0 %v835_v29  ;;  %814 = vmatpush1.bf16.msra.mxu1 %v813_v35  ;;  %v783_v55 = vld [vmem:[%s1229_s3 + $0x110] sm:$0xff]  ;;  %v428_v57 = vld [vmem:[%s302_s27] sm:$0xff]  ;;  %v821_v59 = vpack.c.bf16 %v347_v52, %v345_v51  ;;  %v843_v60 = vpack.c.bf16 %v793_v54, %v791_v53  ;;  %v795_v63 = vld [vmem:[%s1229_s3 + $0x168] sm:$0xff]  ;;  %s317_s26 = sadd.s32 %s764_s17, %s763_s25 }
  0x17   : > { %816 = vmatprep.subr.bf16.mxu1 %v815_v39  ;;  %v790_v61 = vld [vmem:[%s1229_s3 + $0x140] sm:$0xff]  ;;  %v792_v62 = vld [vmem:[%s1229_s3 + $0x150] sm:$0xff]  ;;  %v797_v0 = vld [vmem:[%s1229_s3 + $0x178] sm:$0xff]  ;;  %s765_s28 = sshll.u32 %s317_s26, 3 }
  0x18   : > { %v350_v1 = vld [vmem:[%s1229_s3 + $0x88] sm:$0xff]  ;;  %v845_v2 = vpack.c.bf16 %v792_v62, %v790_v61  ;;  %v847_v3 = vpack.c.bf16 %v797_v0, %v795_v63  ;;  %v794_v4 = vld [vmem:[%s1229_s3 + $0x160] sm:$0xff]  ;;  %v796_v5 = vld [vmem:[%s1229_s3 + $0x170] sm:$0xff]  ;;  %s319_s6 = scalar_lea.vmem %s1231_s5, %s765_s28 }
  0x19   : > { %838 = vmatpush1.bf16.msra.mxu0 %v837_v38  ;;  %v349_v6 = vld [vmem:[%s1229_s3 + $0x80] sm:$0xff]  ;;  %v799_v8 = vld [vmem:[%s1229_s3 + $0x188] sm:$0xff]  ;;  %v801_v9 = vld [vmem:[%s1229_s3 + $0x198] sm:$0xff]  ;;  %v849_v11 = vpack.c.bf16 %v796_v5, %v794_v4 }
  0x1a   : > { %467 = vmatprep.subr.mxu0 %v784_v42  ;;  %818 = vmatpush1.bf16.msra.mxu1 %v817_v44  ;;  %v332_v10 = vld [vmem:[%s294_s10] sm:$0xff]  ;;  %v851_v12 = vpack.c.bf16 %v801_v9, %v799_v8  ;;  %v800_v14 = vld [vmem:[%s1229_s3 + $0x190] sm:$0xff] }
  0x1b   : > { %820 = vmatprep.subr.bf16.mxu1 %v819_v50  ;;  %v798_v13 = vld [vmem:[%s1229_s3 + $0x180] sm:$0xff] }
  0x1c   : > { %v853_v15 = vpack.c.bf16 %v800_v14, %v798_v13  ;;  %v802_v16 = vld [vmem:[%s1229_s3 + $0x1a0] sm:$0xff] }
  0x1d   : > { %468 = vmatpush1.msra.mxu0 %v783_v55  ;;  %v524_v17 = vld [vmem:[%s310_s12] sm:$0xff] }
  0x1e   : > { %840 = vmatprep.subr.bf16.mxu0 %v839_v56  ;;  %785 = vmatmul.mubr.msk.f32.vlgmr.msra.gmra.mrb[0].mxu0 %vm351_vm0, %v428_v57  ;;  %v320_v23 = vld [vmem:[%s1230_s4] sm:$0x3] }
  0x1f   : > { %842 = vmatpush1.bf16.msra.mxu0 %v841_v58  ;;  %822 = vmatpush1.bf16.msra.mxu1 %v821_v59  ;;  %v325_v25 = vrot.slane %v320_v23, %v324_v21  ;;  %v329_v26 = vrot.slane %v320_v23, %v328_v24 }
  0x20   : > { %844 = vmatprep.subr.bf16.mxu0 %v843_v60  ;;  %371 = vmatprep.subr.mxu1 %v350_v1 }
  0x21   : > { %611 = vmatprep.mubr.f32.mxu0 %v942_v7  ;;  %v803_v7 = vld [vmem:[%s1229_s3 + $0x1a8] sm:$0xff] }
  0x23   : > { %846 = vmatpush1.bf16.msra.mxu0 %v845_v2  ;;  %372 = vmatpush1.msra.mxu1 %v349_v6 }
  0x24   : > { %848 = vmatprep.subr.bf16.mxu0 %v847_v3  ;;  %766 = vmatmul.mubr.msk.f32.vlgmr.msra.gmra.mrb[0].mxu1 %vm351_vm0, %v332_v10 }
  0x27   : > { %850 = vmatpush1.bf16.msra.mxu0 %v849_v11 }
  0x28   : > { %852 = vmatprep.subr.bf16.mxu0 %v851_v12 }
  0x2b   : > { %854 = vmatpush1.bf16.msra.mxu0 %v853_v15 }
  0x2c   : > { %563 = vmatprep.subr.mxu0 %v803_v7 }
  0x2f   : > { %564 = vmatpush1.msra.mxu0 %v802_v16 }
  0x30   : > { %804 = vmatmul.mubr.msk.f32.vlgmr.msra.gmra.mrb[0].mxu0 %vm351_vm0, %v524_v17 }
  0xf7   : > { %v421_v20 = vpop.f32.mrb[0].mxu1 }
  0xf8   : > { %v423_v22 = vpop.f32.mrb[1].mxu1  ;;  %v426_v27 = vadd.f32 %v421_v20, %v325_v25 }
  0xf9   : > { %v427_v28 = vadd.f32 %v423_v22, %v329_v26 }
 0x103   : > { %v613_v29 = vpop.f32.mrb[0].mxu0 }
 0x104   : > { %v856_v30 = vadd.f32 %v613_v29, %v426_v27  ;;  %v615_v31 = vpop.f32.mrb[1].mxu0 }
 0x105   : > { %v858_v32 = vadd.f32 %v615_v31, %v427_v28 }
 0x106   : > { %v620_v33 = vmax.f32 %v856_v30, 0.0 }
 0x107   : > { %v621_v34 = vmax.f32 %v858_v32, 0.0 }
 0x108   : > { %622 = vst [vmem:[%s319_s6] sm:$0xff] %v620_v33 }
 0x109   : > { %623 = vst [vmem:[%s319_s6 + $0x8] sm:$0xff] %v621_v34 }
 0x10a PF: > { %s15_s22 = sadd.s32 1, %s940_s22   ;;  %s1232_s18 = smov %s932_s20 }
 0x10b   : > { %p12_p7 = scmp.ge.s32.totalorder %s15_s22, 6   ;;  %s1233_s19 = smov %s936_s21 }
 0x10c   : > { %s1234_s20 = smov %s1237_s23  ;;  %s1235_s21 = smov %s1241_s24 }
 0x10d   :  { %14 = sbr.rel (!%p12_p7) target bundleno = 3 (0x3), region = 78 }

</bundles_post_ra>
